<compile_context>
chip_gen: v7x
topology: tpu7x:2x2x1
jax: 0.10.0
libtpu: 0.0.40
codegen_flags: <defaults>
</compile_context>

<pallas_src>
import functools

import jax
import jax.numpy as jnp
from jax.experimental import pallas as pl
from jax.experimental.pallas import tpu as pltpu


# ---------------------------------------------------------------------------
# Helpers
# ---------------------------------------------------------------------------
def _round_up(x, m):
    return (x + m - 1) // m * m


def _cdiv(a, b):
    return -(-a // b)


def _pad_dim(d, lane_multiple):
    m = lane_multiple if (lane_multiple > 128 and d >= lane_multiple) else 128
    return _round_up(max(d, 1), m)


def _vmem_limit_bytes():
    # v5e/v6e: 128 MiB VMEM/TC -> ~96 MiB scoped; v7x: 64 MiB/TC -> ~48 MiB.
    # Leave ~25% headroom for compiler-internal scratch.
    try:
        cap = int(getattr(pltpu.get_tpu_info(), "vmem_capacity_bytes", 64 << 20))
    except Exception:
        cap = 64 << 20  # conservative (v7x per-TC)
    return int(max(32 << 20, min(cap * 3 // 4, 100 << 20)))


def _apply_activation(y, activation):
    if activation == "tanh":
        return jnp.tanh(y)
    if activation == "relu":
        return jnp.maximum(y, 0.0)
    if activation == "relu6":
        return jnp.clip(y, 0.0, 6.0)
    if activation == "elu":
        # clamp the exp argument so padded / large-positive lanes never see inf
        return jnp.where(y > 0, y, jnp.exp(jnp.minimum(y, 0.0)) - 1.0)
    if activation == "linear":
        return y
    raise ValueError("Activation Function not supported: %s" % activation)


# ---------------------------------------------------------------------------
# Fused kernel: all linears + activations + final softmax in one body
# ---------------------------------------------------------------------------
def _fused_fnn_kernel(*refs, num_linears, activation, out_final, matmul_dtype,
                      record_activations, approx_softmax):
    # refs = [x, w0, b0, ..., w_{L-1}, b_{L-1},
    #         logits, probs, (act_0, ..., act_{L-2} if recorded)]
    x_ref = refs[0]
    wb_refs = refs[1:1 + 2 * num_linears]
    out_refs = refs[1 + 2 * num_linears:]
    logits_ref, probs_ref = out_refs[0], out_refs[1]
    act_refs = out_refs[2:]

    x = x_ref[...]                       # already matmul_dtype (cast host-side)

    # ---- hidden layers ----
    for i in range(num_linears - 1):
        w = wb_refs[2 * i][...]          # (In_pad, Out_pad) pre-transposed
        b = wb_refs[2 * i + 1][...]      # (1, Out_pad)
        y = jnp.dot(x, w, preferred_element_type=jnp.float32)
        y = y + b.astype(jnp.float32)
        y = _apply_activation(y, activation)
        if record_activations:
            act_refs[i][...] = y.astype(act_refs[i].dtype)
        x = y.astype(matmul_dtype)

    # ---- final linear + masked softmax over the padded lane width ----
    w = wb_refs[2 * (num_linears - 1)][...]
    b = wb_refs[2 * (num_linears - 1) + 1][...]
    logits = jnp.dot(x, w, preferred_element_type=jnp.float32)
    logits = logits + b.astype(jnp.float32)
    logits_ref[...] = logits.astype(logits_ref.dtype)

    lane = jax.lax.broadcasted_iota(jnp.int32, logits.shape, dimension=1)
    valid = lane < out_final
    masked = jnp.where(valid, logits, -jnp.inf)
    m = jnp.max(masked, axis=-1, keepdims=True)
    e = jnp.exp(jnp.where(valid, logits - m, -jnp.inf))
    e = jnp.where(valid, e, 0.0)         # robust: pads contribute exactly 0
    denom = jnp.sum(e, axis=-1, keepdims=True)
    probs_ref[...] = (e * pl.reciprocal(denom, approx=approx_softmax)).astype(
        probs_ref.dtype)


# ---------------------------------------------------------------------------
# Wrapper: one pallas_call for the whole network
# ---------------------------------------------------------------------------
def fnn_forward(x, params, activation="tanh", *,
                matmul_dtype=jnp.float32,      # bf16 recommended on v6e/v7x for wide layers
                store_dtype=jnp.float32,       # bf16 halves activation/logit writeback
                record_activations=True,       # eval-mode semantics of the module
                batch_tile=512,
                lane_multiple=128,             # set 256 on v6e/v7x for widths >= 256
                approx_softmax=False):
    """Eval-mode forward: returns (logits, softmax, activations)."""
    B, in_dim = x.shape
    num_linears = len(params)
    widths = [in_dim] + [w.shape[0] for (w, _) in params]
    pads = [_pad_dim(d, lane_multiple) for d in widths]
    out_final = widths[-1]

    bytes_mm = jnp.dtype(matmul_dtype).itemsize
    bytes_st = jnp.dtype(store_dtype).itemsize
    vmem_limit = _vmem_limit_bytes()

    # ---- VMEM budget: resident weights/biases (single-buffered) + I/O tiles ----
    w_res = sum(pads[li] * pads[li + 1] for li in range(num_linears)) * bytes_mm
    b_res = sum(pads[li + 1] for li in range(num_linears)) * bytes_mm
    # TODO(synk): if any single padded weight exceeds ~1/4 of vmem_limit, stream
    # that layer's weight over an extra grid axis / pltpu.emit_pipeline instead
    # of keeping it fully VMEM-resident (needed for e.g. 4096x4096 f32 on v7x).
    row_bytes = 2 * pads[0] * bytes_mm                 # input tile (double-buffered)
    row_bytes += 2 * 2 * pads[-1] * bytes_st           # logits + probs tiles
    if record_activations:
        row_bytes += 2 * sum(pads[1:num_linears]) * bytes_st
    budget = vmem_limit - (w_res + b_res) - (4 << 20)  # headroom
    max_tb = max(8, (budget // max(row_bytes, 1)) // 8 * 8)

    # ---- adaptive batch tiling (no 2x over-padding; >=2 tiles for megacore) ----
    tile_cap = max(8, min(batch_tile, max_tb) // 8 * 8)
    min_tiles = 2 if B > 8 else 1          # keep both v7x TensorCores busy
    n_tiles = max(_cdiv(B, tile_cap), min_tiles)
    TB = _round_up(_cdiv(B, n_tiles), 8)
    B_pad = n_tiles * TB

    # ---- pad / pre-transpose / pre-cast inputs once on the host/XLA side ----
    x_p = jnp.zeros((B_pad, pads[0]), matmul_dtype).at[:B, :in_dim].set(
        x.astype(matmul_dtype))

    wb_inputs = []
    for li, (w, b) in enumerate(params):
        In, Out = widths[li], widths[li + 1]
        Ip, Op = pads[li], pads[li + 1]
        w_t = jnp.zeros((Ip, Op), matmul_dtype).at[:In, :Out].set(
            w.T.astype(matmul_dtype))                  # pre-transposed (In, Out)
        b_p = jnp.zeros((1, Op), matmul_dtype).at[:, :Out].set(
            b.astype(matmul_dtype)[None, :])
        wb_inputs += [w_t, b_p]

    kern = functools.partial(
        _fused_fnn_kernel, num_linears=num_linears, activation=activation,
        out_final=out_final, matmul_dtype=matmul_dtype,
        record_activations=record_activations, approx_softmax=approx_softmax)

    def _build_and_call(weight_pipeline_mode):
        in_specs = [pl.BlockSpec((TB, pads[0]), lambda i: (i, 0))]
        for li in range(num_linears):
            Ip, Op = pads[li], pads[li + 1]
            extra = ({} if weight_pipeline_mode is None
                     else {"pipeline_mode": weight_pipeline_mode})
            # Weights/biases are VMEM-resident across the batch grid (index 0,0);
            # Buffered(1) removes their useless second pipeline buffer.
            in_specs.append(pl.BlockSpec((Ip, Op), lambda i: (0, 0), **extra))
            in_specs.append(pl.BlockSpec((1, Op), lambda i: (0, 0), **extra))

        out_shapes = [jax.ShapeDtypeStruct((B_pad, pads[-1]), store_dtype),  # logits
                      jax.ShapeDtypeStruct((B_pad, pads[-1]), store_dtype)]  # probs
        out_specs = [pl.BlockSpec((TB, pads[-1]), lambda i: (i, 0)),
                     pl.BlockSpec((TB, pads[-1]), lambda i: (i, 0))]
        if record_activations:
            for li in range(num_linears - 1):
                out_shapes.append(
                    jax.ShapeDtypeStruct((B_pad, pads[li + 1]), store_dtype))
                out_specs.append(pl.BlockSpec((TB, pads[li + 1]), lambda i: (i, 0)))

        return pl.pallas_call(
            kern,
            out_shape=tuple(out_shapes),
            grid=(n_tiles,),
            in_specs=in_specs,
            out_specs=tuple(out_specs),
            compiler_params=pltpu.CompilerParams(
                dimension_semantics=("parallel",),
                vmem_limit_bytes=vmem_limit),
        )(x_p, *wb_inputs)

    try:
        outs = _build_and_call(pl.Buffered(1))
    except Exception:
        # Fallback: default double-buffered weights (always supported).
        outs = _build_and_call(None)

    logits = outs[0][:B, :out_final]
    probs = outs[1][:B, :out_final]
    if record_activations:
        activations = [outs[2 + li][:B, :widths[li + 1]]
                       for li in range(num_linears - 1)]
        activations.append(probs)
    else:
        activations = []
    return logits, probs, activations


# ---------------------------------------------------------------------------
# Parameter init (nn.Linear-style uniform, deterministic)
# ---------------------------------------------------------------------------
def init_fnn_params(layer_sizes, key):
    params = []
    for i in range(len(layer_sizes) - 1):
        fan_in, fan_out = layer_sizes[i], layer_sizes[i + 1]
        key, kw, kb = jax.random.split(key, 3)
        bound = 1.0 / jnp.sqrt(jnp.float32(fan_in))
        w = jax.random.uniform(kw, (fan_out, fan_in), jnp.float32, -bound, bound)
        b = jax.random.uniform(kb, (fan_out,), jnp.float32, -bound, bound)
        params.append((w, b))
    return params


# ---------------------------------------------------------------------------
# Demo / self-check
# ---------------------------------------------------------------------------
if __name__ == "__main__":
    layer_sizes = [16, 32, 16, 8]   # input_dim, hidden..., output_dim
    batch = 8
    activation = "tanh"

    key = jax.random.PRNGKey(0)
    key, kx = jax.random.split(key)
    x = jax.random.normal(kx, (batch, layer_sizes[0]), jnp.float32)
    params = init_fnn_params(layer_sizes, key)

    logits, probs, activations = fnn_forward(x, params, activation)
    jax.block_until_ready((logits, probs, activations))

    # plain-JAX reference (eval-mode semantics of the PyTorch module)
    ref = x
    ref_acts = []
    for (w, b) in params[:-1]:
        ref = jnp.tanh(ref @ w.T + b)
        ref_acts.append(ref)
    ref_logits = ref @ params[-1][0].T + params[-1][1]
    ref_probs = jax.nn.softmax(ref_logits, axis=-1)

    assert jnp.allclose(logits, ref_logits, atol=1e-5, rtol=1e-5)
    assert jnp.allclose(probs, ref_probs, atol=1e-5, rtol=1e-5)
    for a, r in zip(activations[:-1], ref_acts):
        assert jnp.allclose(a, r, atol=1e-5, rtol=1e-5)
    assert jnp.allclose(activations[-1], ref_probs, atol=1e-5, rtol=1e-5)
    assert len(activations) == len(layer_sizes) - 1

    print("KERNEL_OK")
</pallas_src>

<mosaic_0001>
module attributes {stable_mosaic.version = 11 : i64} {
  func.func @_fused_fnn_kernel(%arg0: i32, %arg1: memref<8x128xf32, #tpu.memory_space<vmem>>, %arg2: memref<128x128xf32, #tpu.memory_space<vmem>>, %arg3: memref<1x128xf32, #tpu.memory_space<vmem>>, %arg4: memref<128x128xf32, #tpu.memory_space<vmem>>, %arg5: memref<1x128xf32, #tpu.memory_space<vmem>>, %arg6: memref<128x128xf32, #tpu.memory_space<vmem>>, %arg7: memref<1x128xf32, #tpu.memory_space<vmem>>, %arg8: memref<8x128xf32, #tpu.memory_space<vmem>>, %arg9: memref<8x128xf32, #tpu.memory_space<vmem>>, %arg10: memref<8x128xf32, #tpu.memory_space<vmem>>, %arg11: memref<8x128xf32, #tpu.memory_space<vmem>>) attributes {dimension_semantics = [#tpu.dimension_semantics<parallel>], iteration_bounds = array<i64: 1>, scalar_prefetch = 0 : i64, scratch_operands = 0 : i64, tpu.core_type = #tpu.core_type<tc>, window_params = [{transform_indices = @transform_0, window_bounds = array<i64: 8, 128>}, {pipeline_mode = #tpu.pipeline_mode<synchronous>, transform_indices = @transform_1, window_bounds = array<i64: 128, 128>}, {pipeline_mode = #tpu.pipeline_mode<synchronous>, transform_indices = @transform_2, window_bounds = array<i64: 1, 128>}, {pipeline_mode = #tpu.pipeline_mode<synchronous>, transform_indices = @transform_3, window_bounds = array<i64: 128, 128>}, {pipeline_mode = #tpu.pipeline_mode<synchronous>, transform_indices = @transform_4, window_bounds = array<i64: 1, 128>}, {pipeline_mode = #tpu.pipeline_mode<synchronous>, transform_indices = @transform_5, window_bounds = array<i64: 128, 128>}, {pipeline_mode = #tpu.pipeline_mode<synchronous>, transform_indices = @transform_6, window_bounds = array<i64: 1, 128>}, {transform_indices = @transform_7, window_bounds = array<i64: 8, 128>}, {transform_indices = @transform_8, window_bounds = array<i64: 8, 128>}, {transform_indices = @transform_9, window_bounds = array<i64: 8, 128>}, {transform_indices = @transform_10, window_bounds = array<i64: 8, 128>}]} {
    %c0 = arith.constant 0 : index
    %c0_0 = arith.constant 0 : index
    %0 = vector.load %arg1[%c0, %c0_0] : memref<8x128xf32, #tpu.memory_space<vmem>>, vector<8x128xf32>
    %c0_1 = arith.constant 0 : index
    %c0_2 = arith.constant 0 : index
    %1 = vector.load %arg2[%c0_1, %c0_2] : memref<128x128xf32, #tpu.memory_space<vmem>>, vector<128x128xf32>
    %c0_3 = arith.constant 0 : index
    %c0_4 = arith.constant 0 : index
    %2 = vector.load %arg3[%c0_3, %c0_4] : memref<1x128xf32, #tpu.memory_space<vmem>>, vector<1x128xf32>
    %cst = arith.constant dense<0.000000e+00> : vector<8x128xf32>
    %3 = tpu.matmul %0, %1, %cst {dimension_numbers = #tpu.dot_dimension_numbers<[1], [0], [0], [1], [0, 0, 1, 1], [], []>} : vector<8x128xf32>, vector<128x128xf32>, vector<8x128xf32> -> vector<8x128xf32>
    %4 = vector.broadcast %2 : vector<1x128xf32> to vector<8x128xf32>
    %5 = arith.addf %3, %4 : vector<8x128xf32>
    %6 = math.tanh %5 : vector<8x128xf32>
    %c0_5 = arith.constant 0 : index
    %c0_6 = arith.constant 0 : index
    %7 = vector.load %arg10[%c0_5, %c0_6] : memref<8x128xf32, #tpu.memory_space<vmem>>, vector<8x128xf32>
    tpu.vector_store %arg10[%c0_5, %c0_6], %6 {strides = array<i32>} : memref<8x128xf32, #tpu.memory_space<vmem>>, vector<8x128xf32>,
    %c0_7 = arith.constant 0 : index
    %c0_8 = arith.constant 0 : index
    %8 = vector.load %arg4[%c0_7, %c0_8] : memref<128x128xf32, #tpu.memory_space<vmem>>, vector<128x128xf32>
    %c0_9 = arith.constant 0 : index
    %c0_10 = arith.constant 0 : index
    %9 = vector.load %arg5[%c0_9, %c0_10] : memref<1x128xf32, #tpu.memory_space<vmem>>, vector<1x128xf32>
    %cst_11 = arith.constant dense<0.000000e+00> : vector<8x128xf32>
    %10 = tpu.matmul %6, %8, %cst_11 {dimension_numbers = #tpu.dot_dimension_numbers<[1], [0], [0], [1], [0, 0, 1, 1], [], []>} : vector<8x128xf32>, vector<128x128xf32>, vector<8x128xf32> -> vector<8x128xf32>
    %11 = vector.broadcast %9 : vector<1x128xf32> to vector<8x128xf32>
    %12 = arith.addf %10, %11 : vector<8x128xf32>
    %13 = math.tanh %12 : vector<8x128xf32>
    %c0_12 = arith.constant 0 : index
    %c0_13 = arith.constant 0 : index
    %14 = vector.load %arg11[%c0_12, %c0_13] : memref<8x128xf32, #tpu.memory_space<vmem>>, vector<8x128xf32>
    tpu.vector_store %arg11[%c0_12, %c0_13], %13 {strides = array<i32>} : memref<8x128xf32, #tpu.memory_space<vmem>>, vector<8x128xf32>,
    %c0_14 = arith.constant 0 : index
    %c0_15 = arith.constant 0 : index
    %15 = vector.load %arg6[%c0_14, %c0_15] : memref<128x128xf32, #tpu.memory_space<vmem>>, vector<128x128xf32>
    %c0_16 = arith.constant 0 : index
    %c0_17 = arith.constant 0 : index
    %16 = vector.load %arg7[%c0_16, %c0_17] : memref<1x128xf32, #tpu.memory_space<vmem>>, vector<1x128xf32>
    %cst_18 = arith.constant dense<0.000000e+00> : vector<8x128xf32>
    %17 = tpu.matmul %13, %15, %cst_18 {dimension_numbers = #tpu.dot_dimension_numbers<[1], [0], [0], [1], [0, 0, 1, 1], [], []>} : vector<8x128xf32>, vector<128x128xf32>, vector<8x128xf32> -> vector<8x128xf32>
    %18 = vector.broadcast %16 : vector<1x128xf32> to vector<8x128xf32>
    %19 = arith.addf %17, %18 : vector<8x128xf32>
    %c0_19 = arith.constant 0 : index
    %c0_20 = arith.constant 0 : index
    %20 = vector.load %arg8[%c0_19, %c0_20] : memref<8x128xf32, #tpu.memory_space<vmem>>, vector<8x128xf32>
    tpu.vector_store %arg8[%c0_19, %c0_20], %19 {strides = array<i32>} : memref<8x128xf32, #tpu.memory_space<vmem>>, vector<8x128xf32>,
    %21 = tpu.iota {dimensions = array<i32: 1>} : vector<8x128xi32>
    %c8_i32 = arith.constant 8 : i32
    %22 = vector.broadcast %c8_i32 : i32 to vector<8x128xi32>
    %23 = arith.cmpi slt, %21, %22 : vector<8x128xi32>
    %cst_21 = arith.constant 0xFF800000 : f32
    %24 = vector.broadcast %cst_21 : f32 to vector<8x128xf32>
    %25 = arith.select %23, %19, %24 : vector<8x128xi1>, vector<8x128xf32>
    %cst_22 = arith.constant dense<0xFF800000> : vector<8xf32>
    %26 = vector.multi_reduction <maximumf>, %25, %cst_22 [1] : vector<8x128xf32> to vector<8xf32>
    %27 = vector.shape_cast %26 : vector<8xf32> to vector<8x1xf32>
    %28 = vector.broadcast %27 : vector<8x1xf32> to vector<8x128xf32>
    %29 = arith.subf %19, %28 : vector<8x128xf32>
    %cst_23 = arith.constant 0xFF800000 : f32
    %30 = vector.broadcast %cst_23 : f32 to vector<8x128xf32>
    %31 = arith.select %23, %29, %30 : vector<8x128xi1>, vector<8x128xf32>
    %32 = math.exp %31 : vector<8x128xf32>
    %cst_24 = arith.constant 0.000000e+00 : f32
    %33 = vector.broadcast %cst_24 : f32 to vector<8x128xf32>
    %34 = arith.select %23, %32, %33 : vector<8x128xi1>, vector<8x128xf32>
    %cst_25 = arith.constant dense<0.000000e+00> : vector<8xf32>
    %35 = vector.multi_reduction <add>, %34, %cst_25 [1] : vector<8x128xf32> to vector<8xf32>
    %36 = vector.shape_cast %35 : vector<8xf32> to vector<8x1xf32>
    %37 = tpu.reciprocal %36 : vector<8x1xf32> -> vector<8x1xf32>
    %38 = vector.broadcast %37 : vector<8x1xf32> to vector<8x128xf32>
    %39 = arith.mulf %34, %38 : vector<8x128xf32>
    %c0_26 = arith.constant 0 : index
    %c0_27 = arith.constant 0 : index
    %40 = vector.load %arg9[%c0_26, %c0_27] : memref<8x128xf32, #tpu.memory_space<vmem>>, vector<8x128xf32>
    tpu.vector_store %arg9[%c0_26, %c0_27], %39 {strides = array<i32>} : memref<8x128xf32, #tpu.memory_space<vmem>>, vector<8x128xf32>,
    return
  }
  func.func @transform_0(%arg0: i32) -> (i32, i32) {
    %c0_i32 = arith.constant 0 : i32
    %c0_i32_0 = arith.constant 0 : i32
    return %arg0, %c0_i32 : i32, i32
  }
  func.func @transform_1(%arg0: i32) -> (i32, i32) {
    %c0_i32 = arith.constant 0 : i32
    %c0_i32_0 = arith.constant 0 : i32
    %c0_i32_1 = arith.constant 0 : i32
    return %c0_i32, %c0_i32_0 : i32, i32
  }
  func.func @transform_2(%arg0: i32) -> (i32, i32) {
    %c0_i32 = arith.constant 0 : i32
    %c0_i32_0 = arith.constant 0 : i32
    %c0_i32_1 = arith.constant 0 : i32
    return %c0_i32, %c0_i32_0 : i32, i32
  }
  func.func @transform_3(%arg0: i32) -> (i32, i32) {
    %c0_i32 = arith.constant 0 : i32
    %c0_i32_0 = arith.constant 0 : i32
    %c0_i32_1 = arith.constant 0 : i32
    return %c0_i32, %c0_i32_0 : i32, i32
  }
  func.func @transform_4(%arg0: i32) -> (i32, i32) {
    %c0_i32 = arith.constant 0 : i32
    %c0_i32_0 = arith.constant 0 : i32
    %c0_i32_1 = arith.constant 0 : i32
    return %c0_i32, %c0_i32_0 : i32, i32
  }
  func.func @transform_5(%arg0: i32) -> (i32, i32) {
    %c0_i32 = arith.constant 0 : i32
    %c0_i32_0 = arith.constant 0 : i32
    %c0_i32_1 = arith.constant 0 : i32
    return %c0_i32, %c0_i32_0 : i32, i32
  }
  func.func @transform_6(%arg0: i32) -> (i32, i32) {
    %c0_i32 = arith.constant 0 : i32
    %c0_i32_0 = arith.constant 0 : i32
    %c0_i32_1 = arith.constant 0 : i32
    return %c0_i32, %c0_i32_0 : i32, i32
  }
  func.func @transform_7(%arg0: i32) -> (i32, i32) {
    %c0_i32 = arith.constant 0 : i32
    %c0_i32_0 = arith.constant 0 : i32
    return %arg0, %c0_i32 : i32, i32
  }
  func.func @transform_8(%arg0: i32) -> (i32, i32) {
    %c0_i32 = arith.constant 0 : i32
    %c0_i32_0 = arith.constant 0 : i32
    return %arg0, %c0_i32 : i32, i32
  }
  func.func @transform_9(%arg0: i32) -> (i32, i32) {
    %c0_i32 = arith.constant 0 : i32
    %c0_i32_0 = arith.constant 0 : i32
    return %arg0, %c0_i32 : i32, i32
  }
  func.func @transform_10(%arg0: i32) -> (i32, i32) {
    %c0_i32 = arith.constant 0 : i32
    %c0_i32_0 = arith.constant 0 : i32
    return %arg0, %c0_i32 : i32, i32
  }
}

module attributes {stable_mosaic.version = 11 : i64} {
  func.func @_fused_fnn_kernel(%arg0: i32, %arg1: memref<8x128xf32, #tpu.memory_space<vmem>>, %arg2: memref<128x128xf32, #tpu.memory_space<vmem>>, %arg3: memref<1x128xf32, #tpu.memory_space<vmem>>, %arg4: memref<128x128xf32, #tpu.memory_space<vmem>>, %arg5: memref<1x128xf32, #tpu.memory_space<vmem>>, %arg6: memref<128x128xf32, #tpu.memory_space<vmem>>, %arg7: memref<1x128xf32, #tpu.memory_space<vmem>>, %arg8: memref<8x128xf32, #tpu.memory_space<vmem>>, %arg9: memref<8x128xf32, #tpu.memory_space<vmem>>, %arg10: memref<8x128xf32, #tpu.memory_space<vmem>>, %arg11: memref<8x128xf32, #tpu.memory_space<vmem>>) attributes {dimension_semantics = [#tpu.dimension_semantics<parallel>], iteration_bounds = array<i64: 1>, scalar_prefetch = 0 : i64, scratch_operands = 0 : i64, tpu.core_type = #tpu.core_type<tc>, window_params = [{transform_indices = @transform_0, window_bounds = array<i64: 8, 128>}, {pipeline_mode = #tpu.pipeline_mode<synchronous>, transform_indices = @transform_1, window_bounds = array<i64: 128, 128>}, {pipeline_mode = #tpu.pipeline_mode<synchronous>, transform_indices = @transform_2, window_bounds = array<i64: 1, 128>}, {pipeline_mode = #tpu.pipeline_mode<synchronous>, transform_indices = @transform_3, window_bounds = array<i64: 128, 128>}, {pipeline_mode = #tpu.pipeline_mode<synchronous>, transform_indices = @transform_4, window_bounds = array<i64: 1, 128>}, {pipeline_mode = #tpu.pipeline_mode<synchronous>, transform_indices = @transform_5, window_bounds = array<i64: 128, 128>}, {pipeline_mode = #tpu.pipeline_mode<synchronous>, transform_indices = @transform_6, window_bounds = array<i64: 1, 128>}, {transform_indices = @transform_7, window_bounds = array<i64: 8, 128>}, {transform_indices = @transform_8, window_bounds = array<i64: 8, 128>}, {transform_indices = @transform_9, window_bounds = array<i64: 8, 128>}, {transform_indices = @transform_10, window_bounds = array<i64: 8, 128>}]} {
    %c0 = arith.constant 0 : index
    %c0_0 = arith.constant 0 : index
    %0 = vector.load %arg1[%c0, %c0_0] : memref<8x128xf32, #tpu.memory_space<vmem>>, vector<8x128xf32>
    %c0_1 = arith.constant 0 : index
    %c0_2 = arith.constant 0 : index
    %1 = vector.load %arg2[%c0_1, %c0_2] : memref<128x128xf32, #tpu.memory_space<vmem>>, vector<128x128xf32>
    %c0_3 = arith.constant 0 : index
    %c0_4 = arith.constant 0 : index
    %2 = vector.load %arg3[%c0_3, %c0_4] : memref<1x128xf32, #tpu.memory_space<vmem>>, vector<1x128xf32>
    %cst = arith.constant dense<0.000000e+00> : vector<8x128xf32>
    %3 = tpu.matmul %0, %1, %cst {dimension_numbers = #tpu.dot_dimension_numbers<[1], [0], [0], [1], [0, 0, 1, 1], [], []>} : vector<8x128xf32>, vector<128x128xf32>, vector<8x128xf32> -> vector<8x128xf32>
    %4 = vector.broadcast %2 : vector<1x128xf32> to vector<8x128xf32>
    %5 = arith.addf %3, %4 : vector<8x128xf32>
    %6 = math.tanh %5 : vector<8x128xf32>
    %c0_5 = arith.constant 0 : index
    %c0_6 = arith.constant 0 : index
    %7 = vector.load %arg10[%c0_5, %c0_6] : memref<8x128xf32, #tpu.memory_space<vmem>>, vector<8x128xf32>
    tpu.vector_store %arg10[%c0_5, %c0_6], %6 {strides = array<i32>} : memref<8x128xf32, #tpu.memory_space<vmem>>, vector<8x128xf32>,
    %c0_7 = arith.constant 0 : index
    %c0_8 = arith.constant 0 : index
    %8 = vector.load %arg4[%c0_7, %c0_8] : memref<128x128xf32, #tpu.memory_space<vmem>>, vector<128x128xf32>
    %c0_9 = arith.constant 0 : index
    %c0_10 = arith.constant 0 : index
    %9 = vector.load %arg5[%c0_9, %c0_10] : memref<1x128xf32, #tpu.memory_space<vmem>>, vector<1x128xf32>
    %cst_11 = arith.constant dense<0.000000e+00> : vector<8x128xf32>
    %10 = tpu.matmul %6, %8, %cst_11 {dimension_numbers = #tpu.dot_dimension_numbers<[1], [0], [0], [1], [0, 0, 1, 1], [], []>} : vector<8x128xf32>, vector<128x128xf32>, vector<8x128xf32> -> vector<8x128xf32>
    %11 = vector.broadcast %9 : vector<1x128xf32> to vector<8x128xf32>
    %12 = arith.addf %10, %11 : vector<8x128xf32>
    %13 = math.tanh %12 : vector<8x128xf32>
    %c0_12 = arith.constant 0 : index
    %c0_13 = arith.constant 0 : index
    %14 = vector.load %arg11[%c0_12, %c0_13] : memref<8x128xf32, #tpu.memory_space<vmem>>, vector<8x128xf32>
    tpu.vector_store %arg11[%c0_12, %c0_13], %13 {strides = array<i32>} : memref<8x128xf32, #tpu.memory_space<vmem>>, vector<8x128xf32>,
    %c0_14 = arith.constant 0 : index
    %c0_15 = arith.constant 0 : index
    %15 = vector.load %arg6[%c0_14, %c0_15] : memref<128x128xf32, #tpu.memory_space<vmem>>, vector<128x128xf32>
    %c0_16 = arith.constant 0 : index
    %c0_17 = arith.constant 0 : index
    %16 = vector.load %arg7[%c0_16, %c0_17] : memref<1x128xf32, #tpu.memory_space<vmem>>, vector<1x128xf32>
    %cst_18 = arith.constant dense<0.000000e+00> : vector<8x128xf32>
    %17 = tpu.matmul %13, %15, %cst_18 {dimension_numbers = #tpu.dot_dimension_numbers<[1], [0], [0], [1], [0, 0, 1, 1], [], []>} : vector<8x128xf32>, vector<128x128xf32>, vector<8x128xf32> -> vector<8x128xf32>
    %18 = vector.broadcast %16 : vector<1x128xf32> to vector<8x128xf32>
    %19 = arith.addf %17, %18 : vector<8x128xf32>
    %c0_19 = arith.constant 0 : index
    %c0_20 = arith.constant 0 : index
    %20 = vector.load %arg8[%c0_19, %c0_20] : memref<8x128xf32, #tpu.memory_space<vmem>>, vector<8x128xf32>
    tpu.vector_store %arg8[%c0_19, %c0_20], %19 {strides = array<i32>} : memref<8x128xf32, #tpu.memory_space<vmem>>, vector<8x128xf32>,
    %21 = tpu.iota {dimensions = array<i32: 1>} : vector<8x128xi32>
    %c8_i32 = arith.constant 8 : i32
    %22 = vector.broadcast %c8_i32 : i32 to vector<8x128xi32>
    %23 = arith.cmpi slt, %21, %22 : vector<8x128xi32>
    %cst_21 = arith.constant 0xFF800000 : f32
    %24 = vector.broadcast %cst_21 : f32 to vector<8x128xf32>
    %25 = arith.select %23, %19, %24 : vector<8x128xi1>, vector<8x128xf32>
    %cst_22 = arith.constant dense<0xFF800000> : vector<8xf32>
    %26 = vector.multi_reduction <maximumf>, %25, %cst_22 [1] : vector<8x128xf32> to vector<8xf32>
    %27 = vector.shape_cast %26 : vector<8xf32> to vector<8x1xf32>
    %28 = vector.broadcast %27 : vector<8x1xf32> to vector<8x128xf32>
    %29 = arith.subf %19, %28 : vector<8x128xf32>
    %cst_23 = arith.constant 0xFF800000 : f32
    %30 = vector.broadcast %cst_23 : f32 to vector<8x128xf32>
    %31 = arith.select %23, %29, %30 : vector<8x128xi1>, vector<8x128xf32>
    %32 = math.exp %31 : vector<8x128xf32>
    %cst_24 = arith.constant 0.000000e+00 : f32
    %33 = vector.broadcast %cst_24 : f32 to vector<8x128xf32>
    %34 = arith.select %23, %32, %33 : vector<8x128xi1>, vector<8x128xf32>
    %cst_25 = arith.constant dense<0.000000e+00> : vector<8xf32>
    %35 = vector.multi_reduction <add>, %34, %cst_25 [1] : vector<8x128xf32> to vector<8xf32>
    %36 = vector.shape_cast %35 : vector<8xf32> to vector<8x1xf32>
    %37 = tpu.reciprocal %36 : vector<8x1xf32> -> vector<8x1xf32>
    %38 = vector.broadcast %37 : vector<8x1xf32> to vector<8x128xf32>
    %39 = arith.mulf %34, %38 : vector<8x128xf32>
    %c0_26 = arith.constant 0 : index
    %c0_27 = arith.constant 0 : index
    %40 = vector.load %arg9[%c0_26, %c0_27] : memref<8x128xf32, #tpu.memory_space<vmem>>, vector<8x128xf32>
    tpu.vector_store %arg9[%c0_26, %c0_27], %39 {strides = array<i32>} : memref<8x128xf32, #tpu.memory_space<vmem>>, vector<8x128xf32>,
    return
  }
  func.func @transform_0(%arg0: i32) -> (i32, i32) {
    %c0_i32 = arith.constant 0 : i32
    %c0_i32_0 = arith.constant 0 : i32
    return %arg0, %c0_i32 : i32, i32
  }
  func.func @transform_1(%arg0: i32) -> (i32, i32) {
    %c0_i32 = arith.constant 0 : i32
    %c0_i32_0 = arith.constant 0 : i32
    %c0_i32_1 = arith.constant 0 : i32
    return %c0_i32, %c0_i32_0 : i32, i32
  }
  func.func @transform_2(%arg0: i32) -> (i32, i32) {
    %c0_i32 = arith.constant 0 : i32
    %c0_i32_0 = arith.constant 0 : i32
    %c0_i32_1 = arith.constant 0 : i32
    return %c0_i32, %c0_i32_0 : i32, i32
  }
  func.func @transform_3(%arg0: i32) -> (i32, i32) {
    %c0_i32 = arith.constant 0 : i32
    %c0_i32_0 = arith.constant 0 : i32
    %c0_i32_1 = arith.constant 0 : i32
    return %c0_i32, %c0_i32_0 : i32, i32
  }
  func.func @transform_4(%arg0: i32) -> (i32, i32) {
    %c0_i32 = arith.constant 0 : i32
    %c0_i32_0 = arith.constant 0 : i32
    %c0_i32_1 = arith.constant 0 : i32
    return %c0_i32, %c0_i32_0 : i32, i32
  }
  func.func @transform_5(%arg0: i32) -> (i32, i32) {
    %c0_i32 = arith.constant 0 : i32
    %c0_i32_0 = arith.constant 0 : i32
    %c0_i32_1 = arith.constant 0 : i32
    return %c0_i32, %c0_i32_0 : i32, i32
  }
  func.func @transform_6(%arg0: i32) -> (i32, i32) {
    %c0_i32 = arith.constant 0 : i32
    %c0_i32_0 = arith.constant 0 : i32
    %c0_i32_1 = arith.constant 0 : i32
    return %c0_i32, %c0_i32_0 : i32, i32
  }
  func.func @transform_7(%arg0: i32) -> (i32, i32) {
    %c0_i32 = arith.constant 0 : i32
    %c0_i32_0 = arith.constant 0 : i32
    return %arg0, %c0_i32 : i32, i32
  }
  func.func @transform_8(%arg0: i32) -> (i32, i32) {
    %c0_i32 = arith.constant 0 : i32
    %c0_i32_0 = arith.constant 0 : i32
    return %arg0, %c0_i32 : i32, i32
  }
  func.func @transform_9(%arg0: i32) -> (i32, i32) {
    %c0_i32 = arith.constant 0 : i32
    %c0_i32_0 = arith.constant 0 : i32
    return %arg0, %c0_i32 : i32, i32
  }
  func.func @transform_10(%arg0: i32) -> (i32, i32) {
    %c0_i32 = arith.constant 0 : i32
    %c0_i32_0 = arith.constant 0 : i32
    return %arg0, %c0_i32 : i32, i32
  }
}

</mosaic_0001>

<bundles_post_ra>
// kernel: tpu_custom_call.1
= control target key start
LH: loop header
LB: loop body
LE: loop exit
PB: predicated region body
PF: predicated region fallthrough
CT: control target
= control target key end

     0   :  { %16 = vsyncpa [#allocation3], 0  ;;  %s1097_s0 = inlined_call_operand.hbm [shape: f32[8,128], index: 0, kind: input, shape index: {}]   ;;  %s1098_s1 = inlined_call_operand.hbm [shape: f32[128,128], index: 1, kind: input, shape index: {}]   ;;  %s1099_s2 = inlined_call_operand.vmem [shape: f32[1,128], index: 2, kind: input, shape index: {}]   ;;  %s1100_s3 = inlined_call_operand.hbm [shape: f32[128,128], index: 3, kind: input, shape index: {}]   ;;  %s1101_s4 = inlined_call_operand.vmem [shape: f32[1,128], index: 4, kind: input, shape index: {}]   ;;  %s1102_s5 = inlined_call_operand.hbm [shape: f32[128,128], index: 5, kind: input, shape index: {}]   ;;  %s1103_s6 = inlined_call_operand.vmem [shape: f32[1,128], index: 6, kind: input, shape index: {}]   ;;  %s1104_s7 = inlined_call_operand.hbm [shape: f32[8,128], index: 7, kind: output, shape index: {0}]   ;;  %s1105_s8 = inlined_call_operand.hbm [shape: f32[8,128], index: 8, kind: output, shape index: {1}]   ;;  %s1106_s9 = inlined_call_operand.hbm [shape: f32[8,128], index: 9, kind: output, shape index: {2}]   ;;  %s1107_s10 = inlined_call_operand.hbm [shape: f32[8,128], index: 10, kind: output, shape index: {3}]  }
   0x1   :  { %17 = vsyncpa [#allocation6], 0 }
   0x2   :  { %18 = vsyncpa [#allocation9], 0 }
   0x3   :  { %19 = vsyncpa [#allocation4], 0 }
   0x4   :  { %20 = vsyncpa [#allocation12], 0 }
   0x5   :  { %21 = vsyncpa [#allocation15], 0  ;;  %s885_s13 = smov [#allocation5]   ;;  %s697_s17 = scalar_lea.hbm %s1098_s1, 2048 }
   0x6   :  { %s37_s14 = sshll.u32 %s885_s13, 4  ;;  %p698_p0 = scmp.ne.s32.totalorder %s1098_s1, %s697_s17  ;;  %s38_s14 = int_to_ptr.vmem [resolvable:$true] %s37_s14 }
   0x7   :  { %p701_p1 = scmp.lt.u32.totalorder %s697_s17, %s1098_s1 }
   0x9   :  { %p703_p2 = pnand %p701_p1, %p698_p0 }
   0xb   :  { %706 = shalt.err (!%p703_p2)
}
   0xc   :  { %s707_s22 = scalar_lea.vmem %s38_s14, 2048  ;;  %p712_p4 = scmp.lt.s32.totalorder %s38_s14, %s38_s14 }
   0xd   :  { %p708_p3 = scmp.ne.s32.totalorder %s38_s14, %s707_s22  ;;  %p713_p5 = scmp.lt.s32.totalorder %s707_s22, %s707_s22 }
   0xf   :  { %p714_p6 = por %p713_p5, %p712_p4 }
  0x11   :  { %p715_p7 = pnand %p714_p6, %p708_p3 }
  0x13   :  { %718 = shalt.err (!%p715_p7)
}
  0x14   :  { %s886_s23 = smov 128   ;;  %s887_s24 = smov 8  }
  0x15   :  { %43 = dma.hbm_to_vmem [thread:$0]  %s1098_s1, 2048, %s38_s14, [#allocation6], %s886_s23, %s886_s23, %s887_s24  }
  0x16   :  { %s888_s27 = smov [#allocation2]   ;;  %s889_s29 = smov [#allocation7]  }
  0x17   :  { %s28_s28 = sshll.u32 %s888_s27, 4  ;;  %s51_s30 = sshll.u32 %s889_s29, 4  ;;  %s29_s28 = int_to_ptr.vmem [resolvable:$true] %s28_s28  ;;  %s52_s30 = int_to_ptr.vmem [resolvable:$true] %s51_s30 }
  0x18   :  { %s719_s13 = scalar_lea.hbm %s1097_s0, 128 }
  0x19   :  { %p720_p8 = scmp.ne.s32.totalorder %s1097_s0, %s719_s13  ;;  %p723_p9 = scmp.lt.u32.totalorder %s719_s13, %s1097_s0 }
  0x1b   :  { %p725_p10 = pnand %p723_p9, %p720_p8 }
  0x1d   :  { %728 = shalt.err (!%p725_p10)
}
  0x1e   :  { %s729_s1 = scalar_lea.vmem %s29_s28, 128  ;;  %p734_p12 = scmp.lt.s32.totalorder %s29_s28, %s29_s28 }
  0x1f   :  { %p730_p11 = scmp.ne.s32.totalorder %s29_s28, %s729_s1  ;;  %p735_p13 = scmp.lt.s32.totalorder %s729_s1, %s729_s1 }
  0x21   :  { %p736_p0 = por %p735_p13, %p734_p12 }
  0x23   :  { %p737_p1 = pnand %p736_p0, %p730_p11 }
  0x25   :  { %740 = shalt.err (!%p737_p1)
}
  0x26   :  { %31 = dma.hbm_to_vmem [thread:$0]  %s1097_s0, 128, %s29_s28, [#allocation3]  }
  0x27   :  { %s741_s22 = scalar_lea.hbm %s1100_s3, 2048 }
  0x28   :  { %p742_p2 = scmp.ne.s32.totalorder %s1100_s3, %s741_s22  ;;  %p745_p3 = scmp.lt.u32.totalorder %s741_s22, %s1100_s3 }
  0x2a   :  { %p747_p4 = pnand %p745_p3, %p742_p2 }
  0x2c   :  { %750 = shalt.err (!%p747_p4)
}
  0x2d   :  { %s751_s11 = scalar_lea.vmem %s52_s30, 2048  ;;  %p756_p6 = scmp.lt.s32.totalorder %s52_s30, %s52_s30 }
  0x2e   :  { %p752_p5 = scmp.ne.s32.totalorder %s52_s30, %s751_s11  ;;  %p757_p7 = scmp.lt.s32.totalorder %s751_s11, %s751_s11 }
  0x30   :  { %p758_p8 = por %p757_p7, %p756_p6 }
  0x32   :  { %p759_p9 = pnand %p758_p8, %p752_p5 }
  0x34   :  { %762 = shalt.err (!%p759_p9)
}
  0x35   :  { %57 = dma.hbm_to_vmem [thread:$0]  %s1100_s3, 2048, %s52_s30, [#allocation6], %s886_s23, %s886_s23, %s887_s24  }
  0x36   :  { %s890_s12 = smov [#allocation8]   ;;  %s763_s17 = scalar_lea.hbm %s1102_s5, 2048 }
  0x37   :  { %s65_s13 = sshll.u32 %s890_s12, 4  ;;  %p764_p10 = scmp.ne.s32.totalorder %s1102_s5, %s763_s17  ;;  %s66_s13 = int_to_ptr.vmem [resolvable:$true] %s65_s13 }
  0x38   :  { %p767_p11 = scmp.lt.u32.totalorder %s763_s17, %s1102_s5 }
  0x3a   :  { %p769_p12 = pnand %p767_p11, %p764_p10 }
  0x3c   :  { %772 = shalt.err (!%p769_p12)
}
  0x3d   :  { %s773_s20 = scalar_lea.vmem %s66_s13, 2048  ;;  %p778_p0 = scmp.lt.s32.totalorder %s66_s13, %s66_s13 }
  0x3e   :  { %p774_p13 = scmp.ne.s32.totalorder %s66_s13, %s773_s20  ;;  %p779_p1 = scmp.lt.s32.totalorder %s773_s20, %s773_s20 }
  0x40   :  { %p780_p2 = por %p779_p1, %p778_p0 }
  0x42   :  { %p781_p3 = pnand %p780_p2, %p774_p13 }
  0x44   :  { %784 = shalt.err (!%p781_p3)
}
  0x45   :  { %71 = dma.hbm_to_vmem [thread:$0]  %s1102_s5, 2048, %s66_s13, [#allocation9], %s886_s23, %s886_s23, %s887_s24  }
  0x46   :  { %873 = dma.done.wait [#allocation3], 128  }
  0x47   :  { %874 = vsyncadd [#allocation3], 4294967168 }
  0x48   :  { %875 = dma.done.wait [#allocation6], 4096  }
  0x49   :  { %876 = vsyncadd [#allocation6], 4294963200 }
  0x4a   :  { %877 = dma.done.wait [#allocation9], 2048  }
  0x4b   :  { %878 = vsyncadd [#allocation9], 4294965248  ;;  %v891_v0 = vmov 0.0|0.0   ;;  %vm892_vm0 = vmmov 0   ;;  %v893_v1 = vmov 0.0   ;;  %v87_v2 = vld [vmem:[#allocation5] sm:$0xff] }
  0x4c   :  { %604 = vmatprep.subr.bf16.mxu0 %v891_v0  ;;  %531 = vmatprep.mubr.msk.f32.mxu0 %vm892_vm0, %v893_v1  ;;  %v88_v3 = vld [vmem:[#allocation5 + $0x8] sm:$0xff]  ;;  %v89_v4 = vld [vmem:[#allocation5 + $0x10] sm:$0xff]  ;;  %v90_v6 = vld [vmem:[#allocation5 + $0x18] sm:$0xff] }
  0x4d   :  { %628 = vmatprep.subr.bf16.mxu1 %v891_v0  ;;  %566 = vmatprep.mubr.msk.f32.mxu1 %vm892_vm0, %v893_v1  ;;  %v605_v5 = vpack.c.bf16 %v88_v3, %v87_v2  ;;  %v608_v7 = vpack.c.bf16 %v90_v6, %v89_v4  ;;  %v91_v8 = vld [vmem:[#allocation5 + $0x20] sm:$0xff]  ;;  %v92_v9 = vld [vmem:[#allocation5 + $0x28] sm:$0xff]  ;;  %v184_v12 = vld [vmem:[#allocation7 + $0x10] sm:$0xff] }
  0x4e   :  { %v182_v10 = vld [vmem:[#allocation7] sm:$0xff]  ;;  %v183_v11 = vld [vmem:[#allocation7 + $0x8] sm:$0xff]  ;;  %v185_v13 = vld [vmem:[#allocation7 + $0x18] sm:$0xff]  ;;  %v611_v14 = vpack.c.bf16 %v92_v9, %v91_v8 }
  0x4f   :  { %606 = vmatpush3.bf16.msra.mxu0 %v605_v5  ;;  %v629_v15 = vpack.c.bf16 %v183_v11, %v182_v10  ;;  %v93_v16 = vld [vmem:[#allocation5 + $0x30] sm:$0xff]  ;;  %v94_v17 = vld [vmem:[#allocation5 + $0x38] sm:$0xff]  ;;  %v632_v18 = vpack.c.bf16 %v185_v13, %v184_v12  ;;  %v186_v19 = vld [vmem:[#allocation7 + $0x20] sm:$0xff] }
  0x50   :  { %607 = vmatprep.subr.bf16.mxu0 %v891_v0  ;;  %v187_v20 = vld [vmem:[#allocation7 + $0x28] sm:$0xff]  ;;  %v614_v21 = vpack.c.bf16 %v94_v17, %v93_v16  ;;  %v95_v22 = vld [vmem:[#allocation5 + $0x40] sm:$0xff]  ;;  %v188_v25 = vld [vmem:[#allocation7 + $0x30] sm:$0xff] }
  0x51   :  { %630 = vmatpush3.bf16.msra.mxu1 %v629_v15  ;;  %v96_v23 = vld [vmem:[#allocation5 + $0x48] sm:$0xff]  ;;  %v635_v24 = vpack.c.bf16 %v187_v20, %v186_v19  ;;  %v189_v26 = vld [vmem:[#allocation7 + $0x38] sm:$0xff]  ;;  %v97_v28 = vld [vmem:[#allocation5 + $0x50] sm:$0xff] }
  0x52   :  { %631 = vmatprep.subr.bf16.mxu1 %v891_v0  ;;  %v617_v27 = vpack.c.bf16 %v96_v23, %v95_v22  ;;  %v98_v29 = vld [vmem:[#allocation5 + $0x58] sm:$0xff]  ;;  %v638_v30 = vpack.c.bf16 %v189_v26, %v188_v25  ;;  %v190_v31 = vld [vmem:[#allocation7 + $0x40] sm:$0xff]  ;;  %v191_v32 = vld [vmem:[#allocation7 + $0x48] sm:$0xff]  ;;  %v371_v22 = vlaneseq }
  0x53   :  { %609 = vmatpush3.bf16.msra.mxu0 %v608_v7  ;;  %v620_v33 = vpack.c.bf16 %v98_v29, %v97_v28  ;;  %v99_v34 = vld [vmem:[#allocation5 + $0x60] sm:$0xff]  ;;  %v100_v35 = vld [vmem:[#allocation5 + $0x68] sm:$0xff]  ;;  %v641_v36 = vpack.c.bf16 %v191_v32, %v190_v31  ;;  %v101_v38 = vld [vmem:[#allocation5 + $0x70] sm:$0xff] }
  0x54   :  { %610 = vmatprep.subr.bf16.mxu0 %v891_v0  ;;  %v623_v37 = vpack.c.bf16 %v100_v35, %v99_v34  ;;  %v102_v39 = vld [vmem:[#allocation5 + $0x78] sm:$0xff]  ;;  %v192_v42 = vld [vmem:[#allocation7 + $0x50] sm:$0xff]  ;;  %v194_v45 = vld [vmem:[#allocation7 + $0x60] sm:$0xff]  ;;  %v372_v23 = vand.u32 127, %v371_v22 }
  0x55   :  { %633 = vmatpush3.bf16.msra.mxu1 %v632_v18  ;;  %v626_v40 = vpack.c.bf16 %v102_v39, %v101_v38  ;;  %v86_v41 = vld [vmem:[#allocation2] sm:$0xff]  ;;  %v195_v46 = vld [vmem:[#allocation7 + $0x68] sm:$0xff]  ;;  %v196_v48 = vld [vmem:[#allocation7 + $0x70] sm:$0xff] }
  0x56   :  { %634 = vmatprep.subr.bf16.mxu1 %v891_v0  ;;  %v193_v43 = vld [vmem:[#allocation7 + $0x58] sm:$0xff]  ;;  %v647_v47 = vpack.c.bf16 %v195_v46, %v194_v45  ;;  %v277_v51 = vld [vmem:[#allocation8] sm:$0xff]  ;;  %v278_v52 = vld [vmem:[#allocation8 + $0x8] sm:$0xff]  ;;  %vm373_vm1 = vcmp.lt.s32.totalorder %v372_v23, 8 }
  0x57   :  { %612 = vmatpush3.bf16.msra.mxu0 %v611_v14  ;;  %v644_v44 = vpack.c.bf16 %v193_v43, %v192_v42  ;;  %v197_v49 = vld [vmem:[#allocation7 + $0x78] sm:$0xff]  ;;  %v279_v53 = vld [vmem:[#allocation8 + $0x10] sm:$0xff]  ;;  %v653_v54 = vpack.c.bf16 %v278_v52, %v277_v51  ;;  %v281_v57 = vld [vmem:[#allocation8 + $0x20] sm:$0xff] }
  0x58   :  { %613 = vmatprep.subr.bf16.mxu0 %v891_v0  ;;  %v650_v50 = vpack.c.bf16 %v197_v49, %v196_v48  ;;  %v280_v55 = vld [vmem:[#allocation8 + $0x18] sm:$0xff]  ;;  %v282_v58 = vld [vmem:[#allocation8 + $0x28] sm:$0xff]  ;;  %v283_v60 = vld [vmem:[#allocation8 + $0x30] sm:$0xff] }
  0x59   :  { %636 = vmatpush3.bf16.msra.mxu1 %v635_v24  ;;  %v656_v56 = vpack.c.bf16 %v280_v55, %v279_v53  ;;  %v659_v59 = vpack.c.bf16 %v282_v58, %v281_v57  ;;  %v284_v61 = vld [vmem:[#allocation8 + $0x38] sm:$0xff]  ;;  %v285_v63 = vld [vmem:[#allocation8 + $0x40] sm:$0xff]  ;;  %v287_v8 = vld [vmem:[#allocation8 + $0x50] sm:$0xff] }
  0x5a   :  { %637 = vmatprep.subr.bf16.mxu1 %v891_v0  ;;  %v662_v62 = vpack.c.bf16 %v284_v61, %v283_v60  ;;  %v445_v3 = vld [vmem:[%s1099_s2] ss:$0 sm:$0xff]  ;;  %v289_v11 = vld [vmem:[#allocation8 + $0x60] sm:$0xff]  ;;  %v290_v12 = vld [vmem:[#allocation8 + $0x68] sm:$0xff] }
  0x5b   :  { %615 = vmatpush3.bf16.msra.mxu0 %v614_v21  ;;  %v288_v9 = vld [vmem:[#allocation8 + $0x58] sm:$0xff]  ;;  %v671_v13 = vpack.c.bf16 %v290_v12, %v289_v11  ;;  %v291_v14 = vld [vmem:[#allocation8 + $0x70] sm:$0xff] }
  0x5c   :  { %616 = vmatprep.subr.bf16.mxu0 %v891_v0  ;;  %v668_v10 = vpack.c.bf16 %v288_v9, %v287_v8  ;;  %v292_v15 = vld [vmem:[#allocation8 + $0x78] sm:$0xff] }
  0x5d   :  { %639 = vmatpush3.bf16.msra.mxu1 %v638_v30  ;;  %v674_v16 = vpack.c.bf16 %v292_v15, %v291_v14  ;;  %v446_v17 = vld [vmem:[%s1101_s4] ss:$0 sm:$0xff]  ;;  %s894_s4 = smov [#allocation10]  }
  0x5e   :  { %640 = vmatprep.subr.bf16.mxu1 %v891_v0  ;;  %s393_s25 = sshll.u32 %s894_s4, 4  ;;  %s394_s25 = int_to_ptr.vmem [resolvable:$true] %s393_s25 }
  0x5f   :  { %618 = vmatpush3.bf16.msra.mxu0 %v617_v27  ;;  %s785_s26 = scalar_lea.vmem %s394_s25, 128  ;;  %p790_p5 = scmp.lt.s32.totalorder %s394_s25, %s394_s25 }
  0x60   :  { %619 = vmatprep.subr.bf16.mxu0 %v891_v0  ;;  %p786_p4 = scmp.ne.s32.totalorder %s394_s25, %s785_s26  ;;  %p791_p6 = scmp.lt.s32.totalorder %s785_s26, %s785_s26 }
  0x61   :  { %642 = vmatpush3.bf16.msra.mxu1 %v641_v36 }
  0x62   :  { %643 = vmatprep.subr.bf16.mxu1 %v891_v0  ;;  %p792_p7 = por %p791_p6, %p790_p5 }
  0x63   :  { %621 = vmatpush3.bf16.msra.mxu0 %v620_v33 }
  0x64   :  { %622 = vmatprep.subr.bf16.mxu0 %v891_v0  ;;  %p793_p8 = pnand %p792_p7, %p786_p4 }
  0x65   :  { %645 = vmatpush3.bf16.msra.mxu1 %v644_v44 }
  0x66   :  { %646 = vmatprep.subr.bf16.mxu1 %v891_v0 }
  0x67   :  { %624 = vmatpush3.bf16.msra.mxu0 %v623_v37 }
  0x68   :  { %625 = vmatprep.subr.bf16.mxu0 %v891_v0 }
  0x69   :  { %648 = vmatpush3.bf16.msra.mxu1 %v647_v47 }
  0x6a   :  { %649 = vmatprep.subr.bf16.mxu1 %v891_v0 }
  0x6b   :  { %627 = vmatpush3.bf16.msra.mxu0 %v626_v40 }
  0x6c   :  { %652 = vmatprep.subr.bf16.mxu0 %v891_v0 }
  0x6d   :  { %651 = vmatpush3.bf16.msra.mxu1 %v650_v50 }
  0x6e   :  { %532 = vmatmul.mubr.f32.vlgmr.msra.gmra.mrb[0].mxu0 %v86_v41 }
  0x6f   :  { %601 = vmatprep.mubr.msk.f32.mxu0 %vm892_vm0, %v893_v1  ;;  %654 = vmatpush3.bf16.msra.mxu0 %v653_v54  ;;  %v286_v1 = vld [vmem:[#allocation8 + $0x48] sm:$0xff] }
  0x70   :  { %655 = vmatprep.subr.bf16.mxu0 %v891_v0  ;;  %v665_v2 = vpack.c.bf16 %v286_v1, %v285_v63 }
  0x73   :  { %657 = vmatpush3.bf16.msra.mxu0 %v656_v56 }
  0x74   :  { %658 = vmatprep.subr.bf16.mxu0 %v891_v0 }
  0x77   :  { %660 = vmatpush3.bf16.msra.mxu0 %v659_v59 }
  0x78   :  { %661 = vmatprep.subr.bf16.mxu0 %v891_v0 }
  0x7b   :  { %663 = vmatpush3.bf16.msra.mxu0 %v662_v62 }
  0x7c   :  { %664 = vmatprep.subr.bf16.mxu0 %v891_v0 }
  0x7f   :  { %666 = vmatpush3.bf16.msra.mxu0 %v665_v2 }
  0x80   :  { %667 = vmatprep.subr.bf16.mxu0 %v891_v0 }
  0x83   :  { %669 = vmatpush3.bf16.msra.mxu0 %v668_v10 }
  0x84   :  { %670 = vmatprep.subr.bf16.mxu0 %v891_v0 }
  0x87   :  { %672 = vmatpush3.bf16.msra.mxu0 %v671_v13 }
  0x88   :  { %673 = vmatprep.subr.bf16.mxu0 %v891_v0  ;;  %v447_v0 = vld [vmem:[%s1103_s6] ss:$0 sm:$0xff] }
  0x8b   :  { %675 = vmatpush3.bf16.msra.mxu0 %v674_v16 }
 0x141   :  { %v176_v4 = vpop.f32.mrb[0].mxu0 }
 0x142   :  { %v177_v5 = vadd.f32 %v445_v3, %v176_v4  ;;  %v533_v6 = vpop.f32.mrb[1].mxu0 }
 0x144   :  { %689 = vtanh.f32 %v177_v5 }
 0x14e   :  { %v690_v7 = vpop.eup %689 }
 0x14f   :  { %181 = vst [vmem:[#allocation13] sm:$0xff] %v690_v7  ;;  %567 = vmatmul.mubr.f32.vlgmr.msra.gmra.mrb[0].mxu1 %v690_v7 }
 0x222   :  { %v271_v18 = vpop.f32.mrb[0].mxu1 }
 0x223   :  { %v272_v19 = vadd.f32 %v446_v17, %v271_v18  ;;  %v568_v20 = vpop.f32.mrb[1].mxu1 }
 0x225   :  { %691 = vtanh.f32 %v272_v19 }
 0x22f   :  { %v692_v21 = vpop.eup %691 }
 0x230   :  { %276 = vst [vmem:[#allocation14] sm:$0xff] %v692_v21  ;;  %602 = vmatmul.mubr.f32.vlgmr.msra.gmra.mrb[2].mxu0 %v692_v21 }
 0x303   :  { %v366_v24 = vpop.f32.mrb[2].mxu0 }
 0x304   :  { %v367_v25 = vadd.f32 %v447_v0, %v366_v24  ;;  %v603_v26 = vpop.f32.mrb[3].mxu0 }
 0x306   :  { %370 = vst [vmem:[#allocation10] sm:$0xff] %v367_v25  ;;  %v374_v27 = vsel %vm373_vm1, %v367_v25, -inf }
 0x307   :  { %375 = vmax.xlane.f32.xlu0 %v374_v27 }
 0x394   :  { %v376_v28 = vpop.xlane.xlu0 %375 }
 0x395   :  { %v377_v29 = vsub.f32 %v367_v25, %v376_v28 }
 0x397   :  { %v378_v30 = vsel %vm373_vm1, %v377_v29, -inf }
 0x398   :  { %v379_v31 = vmul.f32 1.442695, %v378_v30 }
 0x39a   :  { %693 = vpow2.f32 %v379_v31 }
 0x3a4   :  { %v694_v32 = vpop.eup %693 }
 0x3a5   :  { %v381_v33 = vsel %vm373_vm1, %v694_v32, 0.0 }
 0x3a6   :  { %382 = vadd.xlane.f32.xlu0 %v381_v33 }
 0x3a7   :  { %796 = shalt.err (!%p793_p8)
}
 0x3a8   :  { %s797_s29 = scalar_lea.hbm %s1104_s7, 128 }
 0x3a9   :  { %p798_p9 = scmp.ne.s32.totalorder %s1104_s7, %s797_s29  ;;  %p801_p10 = scmp.lt.u32.totalorder %s797_s29, %s1104_s7 }
 0x3ab   :  { %p803_p11 = pnand %p801_p10, %p798_p9 }
 0x3ad   :  { %806 = shalt.err (!%p803_p11)
}
 0x3ae   :  { %396 = dma.vmem_to_hbm [thread:$0]  %s394_s25, 128, %s1104_s7, [#allocation4]  }
 0x3af   :  { %s895_s16 = smov [#allocation14]  }
 0x3b0   :  { %s423_s17 = sshll.u32 %s895_s16, 4  ;;  %s424_s17 = int_to_ptr.vmem [resolvable:$true] %s423_s17 }
 0x3b1   :  { %s807_s18 = scalar_lea.vmem %s424_s17, 128  ;;  %p812_p13 = scmp.lt.s32.totalorder %s424_s17, %s424_s17 }
 0x3b2   :  { %p808_p12 = scmp.ne.s32.totalorder %s424_s17, %s807_s18  ;;  %p813_p0 = scmp.lt.s32.totalorder %s807_s18, %s807_s18 }
 0x3b4   :  { %p814_p1 = por %p813_p0, %p812_p13 }
 0x3b6   :  { %p815_p2 = pnand %p814_p1, %p808_p12 }
 0x3b8   :  { %818 = shalt.err (!%p815_p2)
}
 0x3b9   :  { %s819_s19 = scalar_lea.hbm %s1107_s10, 128 }
 0x3ba   :  { %p820_p3 = scmp.ne.s32.totalorder %s1107_s10, %s819_s19  ;;  %p823_p4 = scmp.lt.u32.totalorder %s819_s19, %s1107_s10 }
 0x3bc   :  { %p825_p5 = pnand %p823_p4, %p820_p3 }
 0x3be   :  { %828 = shalt.err (!%p825_p5)
}
 0x3bf   :  { %426 = dma.vmem_to_hbm [thread:$0]  %s424_s17, 128, %s1107_s10, [#allocation15]  }
 0x3c0   :  { %s896_s2 = smov [#allocation11]   ;;  %s897_s21 = smov [#allocation13]  }
 0x3c1   :  { %s403_s24 = sshll.u32 %s896_s2, 4  ;;  %s413_s22 = sshll.u32 %s897_s21, 4  ;;  %s404_s24 = int_to_ptr.vmem [resolvable:$true] %s403_s24  ;;  %s414_s22 = int_to_ptr.vmem [resolvable:$true] %s413_s22 }
 0x3c2   :  { %s829_s4 = scalar_lea.vmem %s404_s24, 128  ;;  %p834_p7 = scmp.lt.s32.totalorder %s404_s24, %s404_s24 }
 0x3c3   :  { %p830_p6 = scmp.ne.s32.totalorder %s404_s24, %s829_s4  ;;  %p835_p8 = scmp.lt.s32.totalorder %s829_s4, %s829_s4 }
 0x3c5   :  { %p836_p9 = por %p835_p8, %p834_p7 }
 0x3c7   :  { %p837_p10 = pnand %p836_p9, %p830_p6 }
 0x433   :  { %v383_v34 = vpop.xlane.xlu0 %382 }
 0x434   :  { %695 = vrcp.f32 %v383_v34 }
 0x43e   :  { %v696_v35 = vpop.eup %695 }
 0x43f   :  { %v385_v36 = vmul.f32 %v696_v35, %v381_v33 }
 0x441   :  { %386 = vst [vmem:[#allocation11] sm:$0xff] %v385_v36 }
 0x442   :  { %840 = shalt.err (!%p837_p10)
}
 0x443   :  { %s841_s26 = scalar_lea.hbm %s1105_s8, 128 }
 0x444   :  { %p842_p11 = scmp.ne.s32.totalorder %s1105_s8, %s841_s26  ;;  %p845_p12 = scmp.lt.u32.totalorder %s841_s26, %s1105_s8 }
 0x446   :  { %p847_p13 = pnand %p845_p12, %p842_p11 }
 0x448   :  { %850 = shalt.err (!%p847_p13)
}
 0x449   :  { %406 = dma.vmem_to_hbm [thread:$0]  %s404_s24, 128, %s1105_s8, [#allocation12]  }
 0x44a   :  { %s851_s12 = scalar_lea.vmem %s414_s22, 128  ;;  %p856_p1 = scmp.lt.s32.totalorder %s414_s22, %s414_s22 }
 0x44b   :  { %p852_p0 = scmp.ne.s32.totalorder %s414_s22, %s851_s12  ;;  %p857_p2 = scmp.lt.s32.totalorder %s851_s12, %s851_s12 }
 0x44d   :  { %p858_p3 = por %p857_p2, %p856_p1 }
 0x44f   :  { %p859_p4 = pnand %p858_p3, %p852_p0 }
 0x451   :  { %862 = shalt.err (!%p859_p4)
}
 0x452   :  { %s863_s16 = scalar_lea.hbm %s1106_s9, 128 }
 0x453   :  { %p864_p5 = scmp.ne.s32.totalorder %s1106_s9, %s863_s16  ;;  %p867_p6 = scmp.lt.u32.totalorder %s863_s16, %s1106_s9 }
 0x455   :  { %p869_p7 = pnand %p867_p6, %p864_p5 }
 0x457   :  { %872 = shalt.err (!%p869_p7)
}
 0x458   :  { %416 = dma.vmem_to_hbm [thread:$0]  %s414_s22, 128, %s1106_s9, [#allocation12]  }
 0x459   :  { %879 = dma.done.wait [#allocation4], 128  }
 0x45a   :  { %880 = vsyncadd [#allocation4], 4294967168 }
 0x45b   :  { %881 = dma.done.wait [#allocation12], 256  }
 0x45c   :  { %882 = vsyncadd [#allocation12], 4294967040 }
 0x45d   :  { %883 = dma.done.wait [#allocation15], 128  }
 0x45e   :  { %884 = vsyncadd [#allocation15], 4294967168 }
 0x45f   :  { %439 = vsyncpa [#allocation3], 1 }
 0x460   :  { %440 = vsyncpa [#allocation6], 1 }
 0x461   :  { %441 = vsyncpa [#allocation9], 1 }
 0x462   :  { %442 = vsyncpa [#allocation4], 1 }
 0x463   :  { %443 = vsyncpa [#allocation12], 1 }
 0x464   :  { %444 = vsyncpa [#allocation15], 1 }

// kernel: tpu_custom_call.1
= control target key start
LH: loop header
LB: loop body
LE: loop exit
PB: predicated region body
PF: predicated region fallthrough
CT: control target
= control target key end

     0   :  { %16 = vsyncpa [#allocation3], 0  ;;  %s1097_s0 = inlined_call_operand.hbm [shape: f32[8,128], index: 0, kind: input, shape index: {}]   ;;  %s1098_s1 = inlined_call_operand.hbm [shape: f32[128,128], index: 1, kind: input, shape index: {}]   ;;  %s1099_s2 = inlined_call_operand.vmem [shape: f32[1,128], index: 2, kind: input, shape index: {}]   ;;  %s1100_s3 = inlined_call_operand.hbm [shape: f32[128,128], index: 3, kind: input, shape index: {}]   ;;  %s1101_s4 = inlined_call_operand.vmem [shape: f32[1,128], index: 4, kind: input, shape index: {}]   ;;  %s1102_s5 = inlined_call_operand.hbm [shape: f32[128,128], index: 5, kind: input, shape index: {}]   ;;  %s1103_s6 = inlined_call_operand.vmem [shape: f32[1,128], index: 6, kind: input, shape index: {}]   ;;  %s1104_s7 = inlined_call_operand.hbm [shape: f32[8,128], index: 7, kind: output, shape index: {0}]   ;;  %s1105_s8 = inlined_call_operand.hbm [shape: f32[8,128], index: 8, kind: output, shape index: {1}]   ;;  %s1106_s9 = inlined_call_operand.hbm [shape: f32[8,128], index: 9, kind: output, shape index: {2}]   ;;  %s1107_s10 = inlined_call_operand.hbm [shape: f32[8,128], index: 10, kind: output, shape index: {3}]  }
   0x1   :  { %17 = vsyncpa [#allocation6], 0 }
   0x2   :  { %18 = vsyncpa [#allocation9], 0 }
   0x3   :  { %19 = vsyncpa [#allocation4], 0 }
   0x4   :  { %20 = vsyncpa [#allocation12], 0 }
   0x5   :  { %21 = vsyncpa [#allocation15], 0  ;;  %s885_s13 = smov [#allocation5]   ;;  %s697_s17 = scalar_lea.hbm %s1098_s1, 2048 }
   0x6   :  { %s37_s14 = sshll.u32 %s885_s13, 4  ;;  %p698_p0 = scmp.ne.s32.totalorder %s1098_s1, %s697_s17  ;;  %s38_s14 = int_to_ptr.vmem [resolvable:$true] %s37_s14 }
   0x7   :  { %p701_p1 = scmp.lt.u32.totalorder %s697_s17, %s1098_s1 }
   0x9   :  { %p703_p2 = pnand %p701_p1, %p698_p0 }
   0xb   :  { %706 = shalt.err (!%p703_p2)
}
   0xc   :  { %s707_s22 = scalar_lea.vmem %s38_s14, 2048  ;;  %p712_p4 = scmp.lt.s32.totalorder %s38_s14, %s38_s14 }
   0xd   :  { %p708_p3 = scmp.ne.s32.totalorder %s38_s14, %s707_s22  ;;  %p713_p5 = scmp.lt.s32.totalorder %s707_s22, %s707_s22 }
   0xf   :  { %p714_p6 = por %p713_p5, %p712_p4 }
  0x11   :  { %p715_p7 = pnand %p714_p6, %p708_p3 }
  0x13   :  { %718 = shalt.err (!%p715_p7)
}
  0x14   :  { %s886_s23 = smov 128   ;;  %s887_s24 = smov 8  }
  0x15   :  { %43 = dma.hbm_to_vmem [thread:$0]  %s1098_s1, 2048, %s38_s14, [#allocation6], %s886_s23, %s886_s23, %s887_s24  }
  0x16   :  { %s888_s27 = smov [#allocation2]   ;;  %s889_s29 = smov [#allocation7]  }
  0x17   :  { %s28_s28 = sshll.u32 %s888_s27, 4  ;;  %s51_s30 = sshll.u32 %s889_s29, 4  ;;  %s29_s28 = int_to_ptr.vmem [resolvable:$true] %s28_s28  ;;  %s52_s30 = int_to_ptr.vmem [resolvable:$true] %s51_s30 }
  0x18   :  { %s719_s13 = scalar_lea.hbm %s1097_s0, 128 }
  0x19   :  { %p720_p8 = scmp.ne.s32.totalorder %s1097_s0, %s719_s13  ;;  %p723_p9 = scmp.lt.u32.totalorder %s719_s13, %s1097_s0 }
  0x1b   :  { %p725_p10 = pnand %p723_p9, %p720_p8 }
  0x1d   :  { %728 = shalt.err (!%p725_p10)
}
  0x1e   :  { %s729_s1 = scalar_lea.vmem %s29_s28, 128  ;;  %p734_p12 = scmp.lt.s32.totalorder %s29_s28, %s29_s28 }
  0x1f   :  { %p730_p11 = scmp.ne.s32.totalorder %s29_s28, %s729_s1  ;;  %p735_p13 = scmp.lt.s32.totalorder %s729_s1, %s729_s1 }
  0x21   :  { %p736_p0 = por %p735_p13, %p734_p12 }
  0x23   :  { %p737_p1 = pnand %p736_p0, %p730_p11 }
  0x25   :  { %740 = shalt.err (!%p737_p1)
}
  0x26   :  { %31 = dma.hbm_to_vmem [thread:$0]  %s1097_s0, 128, %s29_s28, [#allocation3]  }
  0x27   :  { %s741_s22 = scalar_lea.hbm %s1100_s3, 2048 }
  0x28   :  { %p742_p2 = scmp.ne.s32.totalorder %s1100_s3, %s741_s22  ;;  %p745_p3 = scmp.lt.u32.totalorder %s741_s22, %s1100_s3 }
  0x2a   :  { %p747_p4 = pnand %p745_p3, %p742_p2 }
  0x2c   :  { %750 = shalt.err (!%p747_p4)
}
  0x2d   :  { %s751_s11 = scalar_lea.vmem %s52_s30, 2048  ;;  %p756_p6 = scmp.lt.s32.totalorder %s52_s30, %s52_s30 }
  0x2e   :  { %p752_p5 = scmp.ne.s32.totalorder %s52_s30, %s751_s11  ;;  %p757_p7 = scmp.lt.s32.totalorder %s751_s11, %s751_s11 }
  0x30   :  { %p758_p8 = por %p757_p7, %p756_p6 }
  0x32   :  { %p759_p9 = pnand %p758_p8, %p752_p5 }
  0x34   :  { %762 = shalt.err (!%p759_p9)
}
  0x35   :  { %57 = dma.hbm_to_vmem [thread:$0]  %s1100_s3, 2048, %s52_s30, [#allocation6], %s886_s23, %s886_s23, %s887_s24  }
  0x36   :  { %s890_s12 = smov [#allocation8]   ;;  %s763_s17 = scalar_lea.hbm %s1102_s5, 2048 }
  0x37   :  { %s65_s13 = sshll.u32 %s890_s12, 4  ;;  %p764_p10 = scmp.ne.s32.totalorder %s1102_s5, %s763_s17  ;;  %s66_s13 = int_to_ptr.vmem [resolvable:$true] %s65_s13 }
  0x38   :  { %p767_p11 = scmp.lt.u32.totalorder %s763_s17, %s1102_s5 }
  0x3a   :  { %p769_p12 = pnand %p767_p11, %p764_p10 }
  0x3c   :  { %772 = shalt.err (!%p769_p12)
}
  0x3d   :  { %s773_s20 = scalar_lea.vmem %s66_s13, 2048  ;;  %p778_p0 = scmp.lt.s32.totalorder %s66_s13, %s66_s13 }
  0x3e   :  { %p774_p13 = scmp.ne.s32.totalorder %s66_s13, %s773_s20  ;;  %p779_p1 = scmp.lt.s32.totalorder %s773_s20, %s773_s20 }
  0x40   :  { %p780_p2 = por %p779_p1, %p778_p0 }
  0x42   :  { %p781_p3 = pnand %p780_p2, %p774_p13 }
  0x44   :  { %784 = shalt.err (!%p781_p3)
}
  0x45   :  { %71 = dma.hbm_to_vmem [thread:$0]  %s1102_s5, 2048, %s66_s13, [#allocation9], %s886_s23, %s886_s23, %s887_s24  }
  0x46   :  { %873 = dma.done.wait [#allocation3], 128  }
  0x47   :  { %874 = vsyncadd [#allocation3], 4294967168 }
  0x48   :  { %875 = dma.done.wait [#allocation6], 4096  }
  0x49   :  { %876 = vsyncadd [#allocation6], 4294963200 }
  0x4a   :  { %877 = dma.done.wait [#allocation9], 2048  }
  0x4b   :  { %878 = vsyncadd [#allocation9], 4294965248  ;;  %v891_v0 = vmov 0.0|0.0   ;;  %vm892_vm0 = vmmov 0   ;;  %v893_v1 = vmov 0.0   ;;  %v87_v2 = vld [vmem:[#allocation5] sm:$0xff] }
  0x4c   :  { %604 = vmatprep.subr.bf16.mxu0 %v891_v0  ;;  %531 = vmatprep.mubr.msk.f32.mxu0 %vm892_vm0, %v893_v1  ;;  %v88_v3 = vld [vmem:[#allocation5 + $0x8] sm:$0xff]  ;;  %v89_v4 = vld [vmem:[#allocation5 + $0x10] sm:$0xff]  ;;  %v90_v6 = vld [vmem:[#allocation5 + $0x18] sm:$0xff] }
  0x4d   :  { %628 = vmatprep.subr.bf16.mxu1 %v891_v0  ;;  %566 = vmatprep.mubr.msk.f32.mxu1 %vm892_vm0, %v893_v1  ;;  %v605_v5 = vpack.c.bf16 %v88_v3, %v87_v2  ;;  %v608_v7 = vpack.c.bf16 %v90_v6, %v89_v4  ;;  %v91_v8 = vld [vmem:[#allocation5 + $0x20] sm:$0xff]  ;;  %v92_v9 = vld [vmem:[#allocation5 + $0x28] sm:$0xff]  ;;  %v184_v12 = vld [vmem:[#allocation7 + $0x10] sm:$0xff] }
  0x4e   :  { %v182_v10 = vld [vmem:[#allocation7] sm:$0xff]  ;;  %v183_v11 = vld [vmem:[#allocation7 + $0x8] sm:$0xff]  ;;  %v185_v13 = vld [vmem:[#allocation7 + $0x18] sm:$0xff]  ;;  %v611_v14 = vpack.c.bf16 %v92_v9, %v91_v8 }
  0x4f   :  { %606 = vmatpush3.bf16.msra.mxu0 %v605_v5  ;;  %v629_v15 = vpack.c.bf16 %v183_v11, %v182_v10  ;;  %v93_v16 = vld [vmem:[#allocation5 + $0x30] sm:$0xff]  ;;  %v94_v17 = vld [vmem:[#allocation5 + $0x38] sm:$0xff]  ;;  %v632_v18 = vpack.c.bf16 %v185_v13, %v184_v12  ;;  %v186_v19 = vld [vmem:[#allocation7 + $0x20] sm:$0xff] }
  0x50   :  { %607 = vmatprep.subr.bf16.mxu0 %v891_v0  ;;  %v187_v20 = vld [vmem:[#allocation7 + $0x28] sm:$0xff]  ;;  %v614_v21 = vpack.c.bf16 %v94_v17, %v93_v16  ;;  %v95_v22 = vld [vmem:[#allocation5 + $0x40] sm:$0xff]  ;;  %v188_v25 = vld [vmem:[#allocation7 + $0x30] sm:$0xff] }
  0x51   :  { %630 = vmatpush3.bf16.msra.mxu1 %v629_v15  ;;  %v96_v23 = vld [vmem:[#allocation5 + $0x48] sm:$0xff]  ;;  %v635_v24 = vpack.c.bf16 %v187_v20, %v186_v19  ;;  %v189_v26 = vld [vmem:[#allocation7 + $0x38] sm:$0xff]  ;;  %v97_v28 = vld [vmem:[#allocation5 + $0x50] sm:$0xff] }
  0x52   :  { %631 = vmatprep.subr.bf16.mxu1 %v891_v0  ;;  %v617_v27 = vpack.c.bf16 %v96_v23, %v95_v22  ;;  %v98_v29 = vld [vmem:[#allocation5 + $0x58] sm:$0xff]  ;;  %v638_v30 = vpack.c.bf16 %v189_v26, %v188_v25  ;;  %v190_v31 = vld [vmem:[#allocation7 + $0x40] sm:$0xff]  ;;  %v191_v32 = vld [vmem:[#allocation7 + $0x48] sm:$0xff]  ;;  %v371_v22 = vlaneseq }
  0x53   :  { %609 = vmatpush3.bf16.msra.mxu0 %v608_v7  ;;  %v620_v33 = vpack.c.bf16 %v98_v29, %v97_v28  ;;  %v99_v34 = vld [vmem:[#allocation5 + $0x60] sm:$0xff]  ;;  %v100_v35 = vld [vmem:[#allocation5 + $0x68] sm:$0xff]  ;;  %v641_v36 = vpack.c.bf16 %v191_v32, %v190_v31  ;;  %v101_v38 = vld [vmem:[#allocation5 + $0x70] sm:$0xff] }
  0x54   :  { %610 = vmatprep.subr.bf16.mxu0 %v891_v0  ;;  %v623_v37 = vpack.c.bf16 %v100_v35, %v99_v34  ;;  %v102_v39 = vld [vmem:[#allocation5 + $0x78] sm:$0xff]  ;;  %v192_v42 = vld [vmem:[#allocation7 + $0x50] sm:$0xff]  ;;  %v194_v45 = vld [vmem:[#allocation7 + $0x60] sm:$0xff]  ;;  %v372_v23 = vand.u32 127, %v371_v22 }
  0x55   :  { %633 = vmatpush3.bf16.msra.mxu1 %v632_v18  ;;  %v626_v40 = vpack.c.bf16 %v102_v39, %v101_v38  ;;  %v86_v41 = vld [vmem:[#allocation2] sm:$0xff]  ;;  %v195_v46 = vld [vmem:[#allocation7 + $0x68] sm:$0xff]  ;;  %v196_v48 = vld [vmem:[#allocation7 + $0x70] sm:$0xff] }
  0x56   :  { %634 = vmatprep.subr.bf16.mxu1 %v891_v0  ;;  %v193_v43 = vld [vmem:[#allocation7 + $0x58] sm:$0xff]  ;;  %v647_v47 = vpack.c.bf16 %v195_v46, %v194_v45  ;;  %v277_v51 = vld [vmem:[#allocation8] sm:$0xff]  ;;  %v278_v52 = vld [vmem:[#allocation8 + $0x8] sm:$0xff]  ;;  %vm373_vm1 = vcmp.lt.s32.totalorder %v372_v23, 8 }
  0x57   :  { %612 = vmatpush3.bf16.msra.mxu0 %v611_v14  ;;  %v644_v44 = vpack.c.bf16 %v193_v43, %v192_v42  ;;  %v197_v49 = vld [vmem:[#allocation7 + $0x78] sm:$0xff]  ;;  %v279_v53 = vld [vmem:[#allocation8 + $0x10] sm:$0xff]  ;;  %v653_v54 = vpack.c.bf16 %v278_v52, %v277_v51  ;;  %v281_v57 = vld [vmem:[#allocation8 + $0x20] sm:$0xff] }
  0x58   :  { %613 = vmatprep.subr.bf16.mxu0 %v891_v0  ;;  %v650_v50 = vpack.c.bf16 %v197_v49, %v196_v48  ;;  %v280_v55 = vld [vmem:[#allocation8 + $0x18] sm:$0xff]  ;;  %v282_v58 = vld [vmem:[#allocation8 + $0x28] sm:$0xff]  ;;  %v283_v60 = vld [vmem:[#allocation8 + $0x30] sm:$0xff] }
  0x59   :  { %636 = vmatpush3.bf16.msra.mxu1 %v635_v24  ;;  %v656_v56 = vpack.c.bf16 %v280_v55, %v279_v53  ;;  %v659_v59 = vpack.c.bf16 %v282_v58, %v281_v57  ;;  %v284_v61 = vld [vmem:[#allocation8 + $0x38] sm:$0xff]  ;;  %v285_v63 = vld [vmem:[#allocation8 + $0x40] sm:$0xff]  ;;  %v287_v8 = vld [vmem:[#allocation8 + $0x50] sm:$0xff] }
  0x5a   :  { %637 = vmatprep.subr.bf16.mxu1 %v891_v0  ;;  %v662_v62 = vpack.c.bf16 %v284_v61, %v283_v60  ;;  %v445_v3 = vld [vmem:[%s1099_s2] ss:$0 sm:$0xff]  ;;  %v289_v11 = vld [vmem:[#allocation8 + $0x60] sm:$0xff]  ;;  %v290_v12 = vld [vmem:[#allocation8 + $0x68] sm:$0xff] }
  0x5b   :  { %615 = vmatpush3.bf16.msra.mxu0 %v614_v21  ;;  %v288_v9 = vld [vmem:[#allocation8 + $0x58] sm:$0xff]  ;;  %v671_v13 = vpack.c.bf16 %v290_v12, %v289_v11  ;;  %v291_v14 = vld [vmem:[#allocation8 + $0x70] sm:$0xff] }
  0x5c   :  { %616 = vmatprep.subr.bf16.mxu0 %v891_v0  ;;  %v668_v10 = vpack.c.bf16 %v288_v9, %v287_v8  ;;  %v292_v15 = vld [vmem:[#allocation8 + $0x78] sm:$0xff] }
  0x5d   :  { %639 = vmatpush3.bf16.msra.mxu1 %v638_v30  ;;  %v674_v16 = vpack.c.bf16 %v292_v15, %v291_v14  ;;  %v446_v17 = vld [vmem:[%s1101_s4] ss:$0 sm:$0xff]  ;;  %s894_s4 = smov [#allocation10]  }
  0x5e   :  { %640 = vmatprep.subr.bf16.mxu1 %v891_v0  ;;  %s393_s25 = sshll.u32 %s894_s4, 4  ;;  %s394_s25 = int_to_ptr.vmem [resolvable:$true] %s393_s25 }
  0x5f   :  { %618 = vmatpush3.bf16.msra.mxu0 %v617_v27  ;;  %s785_s26 = scalar_lea.vmem %s394_s25, 128  ;;  %p790_p5 = scmp.lt.s32.totalorder %s394_s25, %s394_s25 }
  0x60   :  { %619 = vmatprep.subr.bf16.mxu0 %v891_v0  ;;  %p786_p4 = scmp.ne.s32.totalorder %s394_s25, %s785_s26  ;;  %p791_p6 = scmp.lt.s32.totalorder %s785_s26, %s785_s26 }
  0x61   :  { %642 = vmatpush3.bf16.msra.mxu1 %v641_v36 }
  0x62   :  { %643 = vmatprep.subr.bf16.mxu1 %v891_v0  ;;  %p792_p7 = por %p791_p6, %p790_p5 }
  0x63   :  { %621 = vmatpush3.bf16.msra.mxu0 %v620_v33 }
  0x64   :  { %622 = vmatprep.subr.bf16.mxu0 %v891_v0  ;;  %p793_p8 = pnand %p792_p7, %p786_p4 }
  0x65   :  { %645 = vmatpush3.bf16.msra.mxu1 %v644_v44 }
  0x66   :  { %646 = vmatprep.subr.bf16.mxu1 %v891_v0 }
  0x67   :  { %624 = vmatpush3.bf16.msra.mxu0 %v623_v37 }
  0x68   :  { %625 = vmatprep.subr.bf16.mxu0 %v891_v0 }
  0x69   :  { %648 = vmatpush3.bf16.msra.mxu1 %v647_v47 }
  0x6a   :  { %649 = vmatprep.subr.bf16.mxu1 %v891_v0 }
  0x6b   :  { %627 = vmatpush3.bf16.msra.mxu0 %v626_v40 }
  0x6c   :  { %652 = vmatprep.subr.bf16.mxu0 %v891_v0 }
  0x6d   :  { %651 = vmatpush3.bf16.msra.mxu1 %v650_v50 }
  0x6e   :  { %532 = vmatmul.mubr.f32.vlgmr.msra.gmra.mrb[0].mxu0 %v86_v41 }
  0x6f   :  { %601 = vmatprep.mubr.msk.f32.mxu0 %vm892_vm0, %v893_v1  ;;  %654 = vmatpush3.bf16.msra.mxu0 %v653_v54  ;;  %v286_v1 = vld [vmem:[#allocation8 + $0x48] sm:$0xff] }
  0x70   :  { %655 = vmatprep.subr.bf16.mxu0 %v891_v0  ;;  %v665_v2 = vpack.c.bf16 %v286_v1, %v285_v63 }
  0x73   :  { %657 = vmatpush3.bf16.msra.mxu0 %v656_v56 }
  0x74   :  { %658 = vmatprep.subr.bf16.mxu0 %v891_v0 }
  0x77   :  { %660 = vmatpush3.bf16.msra.mxu0 %v659_v59 }
  0x78   :  { %661 = vmatprep.subr.bf16.mxu0 %v891_v0 }
  0x7b   :  { %663 = vmatpush3.bf16.msra.mxu0 %v662_v62 }
  0x7c   :  { %664 = vmatprep.subr.bf16.mxu0 %v891_v0 }
  0x7f   :  { %666 = vmatpush3.bf16.msra.mxu0 %v665_v2 }
  0x80   :  { %667 = vmatprep.subr.bf16.mxu0 %v891_v0 }
  0x83   :  { %669 = vmatpush3.bf16.msra.mxu0 %v668_v10 }
  0x84   :  { %670 = vmatprep.subr.bf16.mxu0 %v891_v0 }
  0x87   :  { %672 = vmatpush3.bf16.msra.mxu0 %v671_v13 }
  0x88   :  { %673 = vmatprep.subr.bf16.mxu0 %v891_v0  ;;  %v447_v0 = vld [vmem:[%s1103_s6] ss:$0 sm:$0xff] }
  0x8b   :  { %675 = vmatpush3.bf16.msra.mxu0 %v674_v16 }
 0x141   :  { %v176_v4 = vpop.f32.mrb[0].mxu0 }
 0x142   :  { %v177_v5 = vadd.f32 %v445_v3, %v176_v4  ;;  %v533_v6 = vpop.f32.mrb[1].mxu0 }
 0x144   :  { %689 = vtanh.f32 %v177_v5 }
 0x14e   :  { %v690_v7 = vpop.eup %689 }
 0x14f   :  { %181 = vst [vmem:[#allocation13] sm:$0xff] %v690_v7  ;;  %567 = vmatmul.mubr.f32.vlgmr.msra.gmra.mrb[0].mxu1 %v690_v7 }
 0x222   :  { %v271_v18 = vpop.f32.mrb[0].mxu1 }
 0x223   :  { %v272_v19 = vadd.f32 %v446_v17, %v271_v18  ;;  %v568_v20 = vpop.f32.mrb[1].mxu1 }
 0x225   :  { %691 = vtanh.f32 %v272_v19 }
 0x22f   :  { %v692_v21 = vpop.eup %691 }
 0x230   :  { %276 = vst [vmem:[#allocation14] sm:$0xff] %v692_v21  ;;  %602 = vmatmul.mubr.f32.vlgmr.msra.gmra.mrb[2].mxu0 %v692_v21 }
 0x303   :  { %v366_v24 = vpop.f32.mrb[2].mxu0 }
 0x304   :  { %v367_v25 = vadd.f32 %v447_v0, %v366_v24  ;;  %v603_v26 = vpop.f32.mrb[3].mxu0 }
 0x306   :  { %370 = vst [vmem:[#allocation10] sm:$0xff] %v367_v25  ;;  %v374_v27 = vsel %vm373_vm1, %v367_v25, -inf }
 0x307   :  { %375 = vmax.xlane.f32.xlu0 %v374_v27 }
 0x394   :  { %v376_v28 = vpop.xlane.xlu0 %375 }
 0x395   :  { %v377_v29 = vsub.f32 %v367_v25, %v376_v28 }
 0x397   :  { %v378_v30 = vsel %vm373_vm1, %v377_v29, -inf }
 0x398   :  { %v379_v31 = vmul.f32 1.442695, %v378_v30 }
 0x39a   :  { %693 = vpow2.f32 %v379_v31 }
 0x3a4   :  { %v694_v32 = vpop.eup %693 }
 0x3a5   :  { %v381_v33 = vsel %vm373_vm1, %v694_v32, 0.0 }
 0x3a6   :  { %382 = vadd.xlane.f32.xlu0 %v381_v33 }
 0x3a7   :  { %796 = shalt.err (!%p793_p8)
}
 0x3a8   :  { %s797_s29 = scalar_lea.hbm %s1104_s7, 128 }
 0x3a9   :  { %p798_p9 = scmp.ne.s32.totalorder %s1104_s7, %s797_s29  ;;  %p801_p10 = scmp.lt.u32.totalorder %s797_s29, %s1104_s7 }
 0x3ab   :  { %p803_p11 = pnand %p801_p10, %p798_p9 }
 0x3ad   :  { %806 = shalt.err (!%p803_p11)
}
 0x3ae   :  { %396 = dma.vmem_to_hbm [thread:$0]  %s394_s25, 128, %s1104_s7, [#allocation4]  }
 0x3af   :  { %s895_s16 = smov [#allocation14]  }
 0x3b0   :  { %s423_s17 = sshll.u32 %s895_s16, 4  ;;  %s424_s17 = int_to_ptr.vmem [resolvable:$true] %s423_s17 }
 0x3b1   :  { %s807_s18 = scalar_lea.vmem %s424_s17, 128  ;;  %p812_p13 = scmp.lt.s32.totalorder %s424_s17, %s424_s17 }
 0x3b2   :  { %p808_p12 = scmp.ne.s32.totalorder %s424_s17, %s807_s18  ;;  %p813_p0 = scmp.lt.s32.totalorder %s807_s18, %s807_s18 }
 0x3b4   :  { %p814_p1 = por %p813_p0, %p812_p13 }
 0x3b6   :  { %p815_p2 = pnand %p814_p1, %p808_p12 }
 0x3b8   :  { %818 = shalt.err (!%p815_p2)
}
 0x3b9   :  { %s819_s19 = scalar_lea.hbm %s1107_s10, 128 }
 0x3ba   :  { %p820_p3 = scmp.ne.s32.totalorder %s1107_s10, %s819_s19  ;;  %p823_p4 = scmp.lt.u32.totalorder %s819_s19, %s1107_s10 }
 0x3bc   :  { %p825_p5 = pnand %p823_p4, %p820_p3 }
 0x3be   :  { %828 = shalt.err (!%p825_p5)
}
 0x3bf   :  { %426 = dma.vmem_to_hbm [thread:$0]  %s424_s17, 128, %s1107_s10, [#allocation15]  }
 0x3c0   :  { %s896_s2 = smov [#allocation11]   ;;  %s897_s21 = smov [#allocation13]  }
 0x3c1   :  { %s403_s24 = sshll.u32 %s896_s2, 4  ;;  %s413_s22 = sshll.u32 %s897_s21, 4  ;;  %s404_s24 = int_to_ptr.vmem [resolvable:$true] %s403_s24  ;;  %s414_s22 = int_to_ptr.vmem [resolvable:$true] %s413_s22 }
 0x3c2   :  { %s829_s4 = scalar_lea.vmem %s404_s24, 128  ;;  %p834_p7 = scmp.lt.s32.totalorder %s404_s24, %s404_s24 }
 0x3c3   :  { %p830_p6 = scmp.ne.s32.totalorder %s404_s24, %s829_s4  ;;  %p835_p8 = scmp.lt.s32.totalorder %s829_s4, %s829_s4 }
 0x3c5   :  { %p836_p9 = por %p835_p8, %p834_p7 }
 0x3c7   :  { %p837_p10 = pnand %p836_p9, %p830_p6 }
 0x433   :  { %v383_v34 = vpop.xlane.xlu0 %382 }
 0x434   :  { %695 = vrcp.f32 %v383_v34 }
 0x43e   :  { %v696_v35 = vpop.eup %695 }
 0x43f   :  { %v385_v36 = vmul.f32 %v696_v35, %v381_v33 }
 0x441   :  { %386 = vst [vmem:[#allocation11] sm:$0xff] %v385_v36 }
 0x442   :  { %840 = shalt.err (!%p837_p10)
}
 0x443   :  { %s841_s26 = scalar_lea.hbm %s1105_s8, 128 }
 0x444   :  { %p842_p11 = scmp.ne.s32.totalorder %s1105_s8, %s841_s26  ;;  %p845_p12 = scmp.lt.u32.totalorder %s841_s26, %s1105_s8 }
 0x446   :  { %p847_p13 = pnand %p845_p12, %p842_p11 }
 0x448   :  { %850 = shalt.err (!%p847_p13)
}
 0x449   :  { %406 = dma.vmem_to_hbm [thread:$0]  %s404_s24, 128, %s1105_s8, [#allocation12]  }
 0x44a   :  { %s851_s12 = scalar_lea.vmem %s414_s22, 128  ;;  %p856_p1 = scmp.lt.s32.totalorder %s414_s22, %s414_s22 }
 0x44b   :  { %p852_p0 = scmp.ne.s32.totalorder %s414_s22, %s851_s12  ;;  %p857_p2 = scmp.lt.s32.totalorder %s851_s12, %s851_s12 }
 0x44d   :  { %p858_p3 = por %p857_p2, %p856_p1 }
 0x44f   :  { %p859_p4 = pnand %p858_p3, %p852_p0 }
 0x451   :  { %862 = shalt.err (!%p859_p4)
}
 0x452   :  { %s863_s16 = scalar_lea.hbm %s1106_s9, 128 }
 0x453   :  { %p864_p5 = scmp.ne.s32.totalorder %s1106_s9, %s863_s16  ;;  %p867_p6 = scmp.lt.u32.totalorder %s863_s16, %s1106_s9 }
 0x455   :  { %p869_p7 = pnand %p867_p6, %p864_p5 }
 0x457   :  { %872 = shalt.err (!%p869_p7)
}
 0x458   :  { %416 = dma.vmem_to_hbm [thread:$0]  %s414_s22, 128, %s1106_s9, [#allocation12]  }
 0x459   :  { %879 = dma.done.wait [#allocation4], 128  }
 0x45a   :  { %880 = vsyncadd [#allocation4], 4294967168 }
 0x45b   :  { %881 = dma.done.wait [#allocation12], 256  }
 0x45c   :  { %882 = vsyncadd [#allocation12], 4294967040 }
 0x45d   :  { %883 = dma.done.wait [#allocation15], 128  }
 0x45e   :  { %884 = vsyncadd [#allocation15], 4294967168 }
 0x45f   :  { %439 = vsyncpa [#allocation3], 1 }
 0x460   :  { %440 = vsyncpa [#allocation6], 1 }
 0x461   :  { %441 = vsyncpa [#allocation9], 1 }
 0x462   :  { %442 = vsyncpa [#allocation4], 1 }
 0x463   :  { %443 = vsyncpa [#allocation12], 1 }
 0x464   :  { %444 = vsyncpa [#allocation15], 1 }

</bundles_post_ra>
